<compile_context>
chip_gen: v6e
topology: v6e:2x2x1
jax: 0.10.0
libtpu: 0.0.40
codegen_flags: <defaults>
</compile_context>

<pallas_src>
import jax
import jax.numpy as jnp
from jax.experimental import pallas as pl
from jax.experimental.pallas import tpu as pltpu

_SUBLANE = 8  # f32 sublane granularity for batch-tile rounding


def mlp_logsoftmax_kernel(x_ref, w1_ref, b1_ref, w2_ref, b2_ref, o_ref):
    # ---- linear1 + clamp(min=0): f32 MXU matmul, f32 accumulate ----
    h = jnp.dot(x_ref[...], w1_ref[...], preferred_element_type=jnp.float32)
    h = jnp.maximum(h + b1_ref[...], 0.0)

    # ---- linear2 + clamp(min=0): (TM, H) @ (H, 2) ----
    y = jnp.dot(h, w2_ref[...], preferred_element_type=jnp.float32)
    y = jnp.maximum(y + b2_ref[...], 0.0)

    # ---- 2-class log-softmax, closed form (no lane-axis reduction) ----
    # lse = max(y0, y1) + log1p(exp(-|y0 - y1|));  out = y - lse
    y0 = y[:, 0:1]
    y1 = y[:, 1:2]
    lse = jnp.maximum(y0, y1) + jnp.log1p(jnp.exp(-jnp.abs(y0 - y1)))
    o_ref[...] = (y - lse).astype(o_ref.dtype)


def simple_nn_forward(x, w1, b1, w2, b2, *, tm=2048):
    """x: (B, D) f32; w1: (D, H); b1: (1, H); w2: (H, 2); b2: (1, 2).

    Returns log-softmax logits of shape (B, 2) in f32.
    """
    B, D = x.shape
    H = w1.shape[1]
    out_dim = w2.shape[1]  # == 2 for Simple_nn

    # --- batch tile selection ---
    tm = max(_SUBLANE, (tm // _SUBLANE) * _SUBLANE)
    if B > tm:
        TM = tm  # large batch: grid already has >= 2 steps
    elif B >= 2 * _SUBLANE:
        # Whole batch would fit in one tile; split into two tiles so the
        # "parallel" grid axis gives v7x's second TensorCore work.
        TM = ((pl.cdiv(B, 2) + _SUBLANE - 1) // _SUBLANE) * _SUBLANE
    else:
        TM = B  # tiny batch: single full-array block

    Bp = pl.cdiv(B, TM) * TM
    if Bp != B:
        x = jnp.pad(x, ((0, Bp - B), (0, 0)))  # padded rows sliced off below
    grid = (Bp // TM,)

    out = pl.pallas_call(
        mlp_logsoftmax_kernel,
        out_shape=jax.ShapeDtypeStruct((Bp, out_dim), jnp.float32),
        grid=grid,
        in_specs=[
            pl.BlockSpec((TM, D), lambda i: (i, 0)),       # x: streamed
            pl.BlockSpec((D, H), lambda i: (0, 0)),        # W1: resident
            pl.BlockSpec((1, H), lambda i: (0, 0)),        # b1: resident
            pl.BlockSpec((H, out_dim), lambda i: (0, 0)),  # W2: resident
            pl.BlockSpec((1, out_dim), lambda i: (0, 0)),  # b2: resident
        ],
        # Full-array width (2) block: each (TM, 2) out tile is one contiguous
        # TM*8 B HBM DMA, so the narrow output stays DMA-efficient.
        out_specs=pl.BlockSpec((TM, out_dim), lambda i: (i, 0)),
        compiler_params=pltpu.CompilerParams(
            dimension_semantics=("parallel",),  # v7x: shard batch across 2 TCs
        ),
    )(x, w1, b1, w2, b2)

    return out[:B] if Bp != B else out


def init_linear_params(key, fan_in, fan_out):
    # Matches torch.nn.Linear default init: U(-1/sqrt(fan_in), 1/sqrt(fan_in)).
    kw, kb = jax.random.split(key)
    bound = 1.0 / jnp.sqrt(jnp.float32(fan_in))
    # stored as (fan_in, fan_out) == torch weight (fan_out, fan_in) transposed
    w = jax.random.uniform(kw, (fan_in, fan_out), jnp.float32, -bound, bound)
    b = jax.random.uniform(kb, (1, fan_out), jnp.float32, -bound, bound)
    return w, b


if __name__ == "__main__":
    key = jax.random.PRNGKey(0)
    k_x, k_l1, k_l2 = jax.random.split(key, 3)

    batch, dims_in, hidden = 8, 32, 32
    x = jax.random.normal(k_x, (batch, dims_in), jnp.float32)
    w1, b1 = init_linear_params(k_l1, dims_in, hidden)
    w2, b2 = init_linear_params(k_l2, hidden, 2)

    # jit the wrapper so the (tiny) pre-kernel shape plumbing fuses/constant-folds.
    fwd = jax.jit(simple_nn_forward, static_argnames=("tm",))
    out = fwd(x, w1, b1, w2, b2)
    jax.block_until_ready(out)

    # Pure-f32 reference matching the PyTorch module's semantics.
    h_ref = jnp.maximum(x @ w1 + b1, 0.0)
    y_ref = jnp.maximum(h_ref @ w2 + b2, 0.0)
    ref = jax.nn.log_softmax(y_ref, axis=-1)

    assert out.shape == (batch, 2), f"bad output shape {out.shape}"
    assert jnp.allclose(out, ref, atol=1e-4, rtol=1e-4), "mismatch vs reference"

    print("KERNEL_OK")
</pallas_src>

<mosaic_0001>
module attributes {stable_mosaic.version = 11 : i64} {
  func.func @mlp_logsoftmax_kernel(%arg0: i32, %arg1: memref<8x32xf32, #tpu.memory_space<vmem>>, %arg2: memref<32x32xf32, #tpu.memory_space<vmem>>, %arg3: memref<1x32xf32, #tpu.memory_space<vmem>>, %arg4: memref<32x2xf32, #tpu.memory_space<vmem>>, %arg5: memref<1x2xf32, #tpu.memory_space<vmem>>, %arg6: memref<8x2xf32, #tpu.memory_space<vmem>>) attributes {dimension_semantics = [#tpu.dimension_semantics<parallel>], iteration_bounds = array<i64: 1>, scalar_prefetch = 0 : i64, scratch_operands = 0 : i64, tpu.core_type = #tpu.core_type<tc>, window_params = [{transform_indices = @transform_0, window_bounds = array<i64: 8, 32>}, {pipeline_mode = #tpu.pipeline_mode<synchronous>, transform_indices = @transform_1, window_bounds = array<i64: 32, 32>}, {pipeline_mode = #tpu.pipeline_mode<synchronous>, transform_indices = @transform_2, window_bounds = array<i64: 1, 32>}, {pipeline_mode = #tpu.pipeline_mode<synchronous>, transform_indices = @transform_3, window_bounds = array<i64: 32, 2>}, {pipeline_mode = #tpu.pipeline_mode<synchronous>, transform_indices = @transform_4, window_bounds = array<i64: 1, 2>}, {transform_indices = @transform_5, window_bounds = array<i64: 8, 2>}]} {
    %c0 = arith.constant 0 : index
    %c0_0 = arith.constant 0 : index
    %0 = vector.load %arg1[%c0, %c0_0] : memref<8x32xf32, #tpu.memory_space<vmem>>, vector<8x32xf32>
    %c0_1 = arith.constant 0 : index
    %c0_2 = arith.constant 0 : index
    %1 = vector.load %arg2[%c0_1, %c0_2] : memref<32x32xf32, #tpu.memory_space<vmem>>, vector<32x32xf32>
    %cst = arith.constant dense<0.000000e+00> : vector<8x32xf32>
    %2 = tpu.matmul %0, %1, %cst {dimension_numbers = #tpu.dot_dimension_numbers<[1], [0], [0], [1], [0, 0, 1, 1], [], []>} : vector<8x32xf32>, vector<32x32xf32>, vector<8x32xf32> -> vector<8x32xf32>
    %c0_3 = arith.constant 0 : index
    %c0_4 = arith.constant 0 : index
    %3 = vector.load %arg3[%c0_3, %c0_4] : memref<1x32xf32, #tpu.memory_space<vmem>>, vector<1x32xf32>
    %4 = vector.broadcast %3 : vector<1x32xf32> to vector<8x32xf32>
    %5 = arith.addf %2, %4 : vector<8x32xf32>
    %cst_5 = arith.constant 0.000000e+00 : f32
    %6 = vector.broadcast %cst_5 : f32 to vector<8x32xf32>
    %7 = arith.maximumf %5, %6 : vector<8x32xf32>
    %c0_6 = arith.constant 0 : index
    %c0_7 = arith.constant 0 : index
    %8 = vector.load %arg4[%c0_6, %c0_7] : memref<32x2xf32, #tpu.memory_space<vmem>>, vector<32x2xf32>
    %cst_8 = arith.constant dense<0.000000e+00> : vector<8x2xf32>
    %9 = tpu.matmul %7, %8, %cst_8 {dimension_numbers = #tpu.dot_dimension_numbers<[1], [0], [0], [1], [0, 0, 1, 1], [], []>} : vector<8x32xf32>, vector<32x2xf32>, vector<8x2xf32> -> vector<8x2xf32>
    %c0_9 = arith.constant 0 : index
    %c0_10 = arith.constant 0 : index
    %10 = vector.load %arg5[%c0_9, %c0_10] : memref<1x2xf32, #tpu.memory_space<vmem>>, vector<1x2xf32>
    %11 = vector.broadcast %10 : vector<1x2xf32> to vector<8x2xf32>
    %12 = arith.addf %9, %11 : vector<8x2xf32>
    %cst_11 = arith.constant 0.000000e+00 : f32
    %13 = vector.broadcast %cst_11 : f32 to vector<8x2xf32>
    %14 = arith.maximumf %12, %13 : vector<8x2xf32>
    %15 = vector.extract_strided_slice %14 {offsets = [0, 0], sizes = [8, 1], strides = [1, 1]} : vector<8x2xf32> to vector<8x1xf32>
    %16 = vector.extract_strided_slice %14 {offsets = [0, 1], sizes = [8, 1], strides = [1, 1]} : vector<8x2xf32> to vector<8x1xf32>
    %17 = arith.maximumf %15, %16 : vector<8x1xf32>
    %18 = arith.subf %15, %16 : vector<8x1xf32>
    %19 = math.absf %18 : vector<8x1xf32>
    %cst_12 = arith.constant 0.000000e+00 : f32
    %20 = vector.broadcast %cst_12 : f32 to vector<8x1xf32>
    %21 = arith.subf %20, %19 : vector<8x1xf32>
    %22 = math.exp %21 : vector<8x1xf32>
    %23 = math.log1p %22 : vector<8x1xf32>
    %24 = arith.addf %17, %23 : vector<8x1xf32>
    %25 = vector.broadcast %24 : vector<8x1xf32> to vector<8x2xf32>
    %26 = arith.subf %14, %25 : vector<8x2xf32>
    %c0_13 = arith.constant 0 : index
    %c0_14 = arith.constant 0 : index
    %27 = vector.load %arg6[%c0_13, %c0_14] : memref<8x2xf32, #tpu.memory_space<vmem>>, vector<8x2xf32>
    tpu.vector_store %arg6[%c0_13, %c0_14], %26 {strides = array<i32>} : memref<8x2xf32, #tpu.memory_space<vmem>>, vector<8x2xf32>,
    return
  }
  func.func @transform_0(%arg0: i32) -> (i32, i32) {
    %c0_i32 = arith.constant 0 : i32
    %c0_i32_0 = arith.constant 0 : i32
    return %arg0, %c0_i32 : i32, i32
  }
  func.func @transform_1(%arg0: i32) -> (i32, i32) {
    %c0_i32 = arith.constant 0 : i32
    %c0_i32_0 = arith.constant 0 : i32
    %c0_i32_1 = arith.constant 0 : i32
    return %c0_i32, %c0_i32_0 : i32, i32
  }
  func.func @transform_2(%arg0: i32) -> (i32, i32) {
    %c0_i32 = arith.constant 0 : i32
    %c0_i32_0 = arith.constant 0 : i32
    %c0_i32_1 = arith.constant 0 : i32
    return %c0_i32, %c0_i32_0 : i32, i32
  }
  func.func @transform_3(%arg0: i32) -> (i32, i32) {
    %c0_i32 = arith.constant 0 : i32
    %c0_i32_0 = arith.constant 0 : i32
    %c0_i32_1 = arith.constant 0 : i32
    return %c0_i32, %c0_i32_0 : i32, i32
  }
  func.func @transform_4(%arg0: i32) -> (i32, i32) {
    %c0_i32 = arith.constant 0 : i32
    %c0_i32_0 = arith.constant 0 : i32
    %c0_i32_1 = arith.constant 0 : i32
    return %c0_i32, %c0_i32_0 : i32, i32
  }
  func.func @transform_5(%arg0: i32) -> (i32, i32) {
    %c0_i32 = arith.constant 0 : i32
    %c0_i32_0 = arith.constant 0 : i32
    return %arg0, %c0_i32 : i32, i32
  }
}

</mosaic_0001>

<bundles_post_ra>
// kernel: simple_nn_forward.1
= control target key start
LH: loop header
LB: loop body
LE: loop exit
PB: predicated region body
PF: predicated region fallthrough
CT: control target
= control target key end

     0   :  { %10 = vsyncpa [#allocation3], 0  ;;  %s305_s18 = smov [#allocation2]   ;;  %s378_s0 = inlined_call_operand.hbm [shape: f32[8,32], index: 0, kind: input, shape index: {}]   ;;  %s379_s1 = inlined_call_operand.vmem [shape: f32[32,32], index: 1, kind: input, shape index: {}]   ;;  %s380_s2 = inlined_call_operand.vmem [shape: f32[1,32], index: 2, kind: input, shape index: {}]   ;;  %s381_s3 = inlined_call_operand.vmem [shape: f32[32,2], index: 3, kind: input, shape index: {}]   ;;  %s382_s4 = inlined_call_operand.vmem [shape: f32[1,2], index: 4, kind: input, shape index: {}]   ;;  %s383_s5 = inlined_call_operand.vmem [shape: f32[8,2], index: 5, kind: output, shape index: {}]  }
   0x1   :  { %s17_s19 = sshll.u32 %s305_s18, 4  ;;  %s18_s19 = int_to_ptr.vmem [resolvable:$true] %s17_s19 }
   0x2   :  { %s291_s20 = scalar_lea.vmem %s18_s19, 128  ;;  %p296_p1 = scmp.lt.s32.totalorder %s18_s19, %s18_s19 }
   0x3   :  { %p292_p0 = scmp.ne.s32.totalorder %s18_s19, %s291_s20  ;;  %p297_p2 = scmp.lt.s32.totalorder %s291_s20, %s291_s20 }
   0x5   :  { %p298_p3 = por %p297_p2, %p296_p1 }
   0x7   :  { %p299_p4 = pnand %p298_p3, %p292_p0 }
   0x9   :  { %302 = shalt.err (!%p299_p4)
}
   0xa   :  { %20 = dma.hbm_to_vmem [thread:$0]  %s378_s0, 128, %s18_s19, [#allocation3]  }
   0xb   :  { %303 = dma.done.wait [#allocation3], 128  }
   0xc   :  { %304 = vsyncadd [#allocation3], 4294967168  ;;  %v306_v0 = vmov 0.0   ;;  %vm307_vm0 = vmmov 0   ;;  %v36_v1 = vld [vmem:[%s379_s1 + $0x18] sm:$0xff]  ;;  %v35_v2 = vld [vmem:[%s379_s1 + $0x10] sm:$0xff] }
   0xd   :  { %251 = vmatprep.subr.mxu0 %v306_v0  ;;  %259 = vmatprep.mubr.msk.f32.mxu0 %vm307_vm0, %v306_v0  ;;  %v122_v3 = vld [vmem:[%s381_s3 + $0x18] sm:$0xff]  ;;  %v34_v4 = vld [vmem:[%s379_s1 + $0x8] sm:$0xff]  ;;  %v33_v5 = vld [vmem:[%s379_s1] sm:$0xff]  ;;  %vm44_vm1 = vcmask 261120   ;;  %v309_v20 = vmov 0   ;;  %vm230_vm3 = vcmask 15360  }
   0xe   :  { %262 = vmatprep.subr.mxu1 %v306_v0  ;;  %270 = vmatprep.mubr.msk.f32.mxu1 %vm307_vm0, %v306_v0  ;;  %v32_v6 = vld [vmem:[#allocation2] sm:$0xff]  ;;  %v121_v7 = vld [vmem:[%s381_s3 + $0x10] sm:$0xff]  ;;  %v120_v8 = vld [vmem:[%s381_s3 + $0x8] sm:$0xff] }
   0xf   :  { %252 = vmatpush3.msra.mxu0 %v36_v1  ;;  %263 = vmatpush3.msra.mxu1 %v122_v3  ;;  %v119_v9 = vld [vmem:[%s381_s3] sm:$0xff]  ;;  %s308_s3 = smov 127  }
  0x10   :  { %253 = vmatprep.subr.mxu0 %v306_v0  ;;  %264 = vmatprep.subr.mxu1 %v306_v0  ;;  %v237_v10 = vld [vmem:[%s380_s2] ss:$0 sm:$0xff] }
  0x11   :  { %254 = vmatpush3.msra.mxu0 %v35_v2  ;;  %265 = vmatpush3.msra.mxu1 %v121_v7  ;;  %v239_v15 = vld [vmem:[%s382_s4] ss:$0 sm:$0xff] }
  0x12   :  { %255 = vmatprep.subr.mxu0 %v306_v0  ;;  %266 = vmatprep.subr.mxu1 %v306_v0 }
  0x13   :  { %256 = vmatpush3.msra.mxu0 %v34_v4  ;;  %267 = vmatpush3.msra.mxu1 %v120_v8 }
  0x14   :  { %257 = vmatprep.subr.mxu0 %v306_v0  ;;  %268 = vmatprep.subr.mxu1 %v306_v0 }
  0x15   :  { %258 = vmatpush3.msra.mxu0 %v33_v5  ;;  %269 = vmatpush3.msra.mxu1 %v119_v9 }
  0x16   :  { %260 = vmatmul.mubr.msk.f32.vlgmr.msra.gmra.mxu0 %vm44_vm1, %v32_v6  ;;  %278 = vset.pattern.permute.xlu0 %v309_v20 }
  0xd6   :  { %v114_v11 = vpop.f32.mrf.mxu0 }
  0xd7   :  { %v115_v12 = vadd.f32 %v237_v10, %v114_v11 }
  0xd8   :  { %v261_v13 = vpop.f32.mrf.mxu0 }
  0xd9   :  { %v118_v14 = vmax.f32 %v115_v12, 0.0 }
  0xdb   :  { %271 = vmatmul.mubr.msk.f32.vlgmr.msra.gmra.mxu1 %vm44_vm1, %v118_v14 }
 0x19b   :  { %v199_v16 = vpop.f32.mrf.mxu1 }
 0x19c   :  { %v200_v17 = vadd.f32 %v239_v15, %v199_v16 }
 0x19d   :  { %v272_v18 = vpop.f32.mrf.mxu1 }
 0x19e   :  { %v203_v19 = vmax.f32 %v200_v17, 0.0 }
 0x1a0   :  { %205 = vrot.lane.b32.xlu0 %v203_v19, %s308_s3 }
 0x212   :  { %v206_v21 = vpop.permute.xlu0 %205 }
 0x213   :  { %v209_v22 = vsub.f32 %v203_v19, %v206_v21  ;;  %v208_v34 = vmax.f32 %v203_v19, %v206_v21 }
 0x215   :  { %v210_v23 = vand.u32 2147483647, %v209_v22 }
 0x217   :  { %v211_v24 = vsub.f32 0.0, %v210_v23 }
 0x219   :  { %v212_v25 = vmul.f32 1.442695, %v211_v24 }
 0x21b   :  { %279 = vpow2.f32 %v212_v25 }
 0x228   :  { %v280_v26 = vpop.eup %279 }
 0x229   :  { %v214_v27 = vadd.f32 1.0, %v280_v26  ;;  %v217_v28 = vmul.f32 -0.5, %v280_v26  ;;  %v220_v30 = vand.u32 2147483647, %v280_v26 }
 0x22b   :  { %281 = vlog2.f32 %v214_v27  ;;  %v218_v29 = vadd.f32 1.0, %v217_v28  ;;  %vm221_vm2 = vcmp.lt.f32.partialorder %v220_v30, 0.0004427343 }
 0x22d   :  { %v219_v33 = vmul.f32 %v280_v26, %v218_v29 }
 0x238   :  { %v282_v31 = vpop.eup %281 }
 0x239   :  { %v216_v32 = vmul.f32 0.6931472, %v282_v31 }
 0x23b   :  { %v222_v35 = vsel %vm221_vm2, %v219_v33, %v216_v32 }
 0x23c   :  { %v223_v36 = vadd.f32 %v222_v35, %v208_v34 }
 0x23e   :  { %226 = vperm.xlu0 %278, %v223_v36  }
 0x2b9   :  { %v227_v37 = vpop.permute.xlu0 %226 }
 0x2ba   :  { %v229_v38 = vsub.f32 %v203_v19, %v227_v37 }
 0x2bc   :  { %231 = vst.msk [vmem:[%s383_s5] sm:$0xff] %vm230_vm3, %v229_v38 }
 0x2bd   :  { %236 = vsyncpa [#allocation3], 1 }

</bundles_post_ra>
